<compile_context>
chip_gen: v6e
topology: v6e:2x2x1
jax: 0.10.0
libtpu: 0.0.40
codegen_flags: <defaults>
</compile_context>

<pallas_src>
import jax
import jax.numpy as jnp
from jax import lax
from jax.experimental import pallas as pl
from jax.experimental.pallas import tpu as pltpu

IN_FEATURES = 28 * 28          # 784
HIDDEN = 64
HIDDEN_PAD = 128               # lane-dense hidden width
NUM_CLASSES = 10
PADDED_CLASSES = 128           # lane-dense output width


def bpnet_kernel(x_ref, w1_ref, b1_ref, w2_ref, b2_ref, w3_ref, b3_ref, o_ref):
    # x streams in as f32 (needed at f32 for the L2 normalize anyway).
    x = x_ref[...]                                                   # (TB, 784) f32

    # F.normalize(x, p=2, dim=1): x / max(||x||_2, 1e-12) == x * rsqrt(max(sumsq, 1e-24))
    sumsq = jnp.sum(x * x, axis=1, keepdims=True)
    x = x * lax.rsqrt(jnp.maximum(sumsq, 1e-24))

    # fc1 + ReLU (bf16 MXU, f32 accumulate). Hidden padded to 128 lanes.
    h1 = jnp.dot(x.astype(jnp.bfloat16), w1_ref[...],
                 preferred_element_type=jnp.float32) + b1_ref[...]
    h1 = jnp.maximum(h1, 0.0)

    # fc2 + ReLU
    h2 = jnp.dot(h1.astype(jnp.bfloat16), w2_ref[...],
                 preferred_element_type=jnp.float32) + b2_ref[...]
    h2 = jnp.maximum(h2, 0.0)

    # fc3 (128 padded output lanes; padded lanes carry bias -1e30)
    logits = jnp.dot(h2.astype(jnp.bfloat16), w3_ref[...],
                     preferred_element_type=jnp.float32) + b3_ref[...]

    # softmax(dim=1), numerically stable; padded lanes -> exp(-huge) == 0.
    m = jnp.max(logits, axis=1, keepdims=True)
    e = jnp.exp(logits - m)
    denom = jnp.sum(e, axis=1, keepdims=True)
    o_ref[...] = (e / denom).astype(o_ref.dtype)                     # bf16 store


def prepare_params(params):
    """One-time padding + bf16 casts of the fc weights (hoisted out of forward).

    params: (w1 (784,64), b1 (1,64), w2 (64,64), b2 (1,64), w3 (64,10), b3 (1,10))
    Returns lane-dense padded params:
      w1p (784,128) bf16, b1p (1,128) f32,
      w2p (128,128) bf16, b2p (1,128) f32,
      w3p (128,128) bf16, b3p (1,128) f32 (padded class lanes carry -1e30).
    """
    w1, b1, w2, b2, w3, b3 = params
    H, C = HIDDEN_PAD, PADDED_CLASSES
    w1p = jnp.zeros((IN_FEATURES, H), jnp.float32).at[:, :HIDDEN].set(w1)
    b1p = jnp.zeros((1, H), jnp.float32).at[:, :HIDDEN].set(b1)
    w2p = jnp.zeros((H, H), jnp.float32).at[:HIDDEN, :HIDDEN].set(w2)
    b2p = jnp.zeros((1, H), jnp.float32).at[:, :HIDDEN].set(b2)
    w3p = jnp.zeros((H, C), jnp.float32).at[:HIDDEN, :NUM_CLASSES].set(w3)
    b3p = jnp.full((1, C), -1e30, jnp.float32).at[:, :NUM_CLASSES].set(b3)
    return (w1p.astype(jnp.bfloat16), b1p,
            w2p.astype(jnp.bfloat16), b2p,
            w3p.astype(jnp.bfloat16), b3p)


def _round_up(n, m):
    return ((n + m - 1) // m) * m


def _pick_batch_tile(B, tb_max=1024):
    """Batch tile: as big as possible (<=1024, VMEM-safe even on v5e's 16 MiB
    scoped default), but keep >=2 grid steps when the batch allows so both
    v7x TensorCores get work."""
    bp = _round_up(B, 8)
    if bp > tb_max:
        tb = tb_max
        bp = _round_up(bp, tb)
    else:
        tb = bp
        if bp >= 16 and bp % 16 == 0:
            tb = bp // 2          # grid of 2 for megacore sharding
    return tb, bp


def bpnet_forward(x_nchw, prepped_params, tb_max=1024):
    """x_nchw: (B, 1, 28, 28) float32. prepped_params from prepare_params().
    Returns softmax probs (B, 10) float32."""
    B = x_nchw.shape[0]
    x_flat = x_nchw.reshape(B, -1).astype(jnp.float32)               # (B, 784)
    w1b, b1p, w2b, b2p, w3b, b3p = prepped_params

    tb, bp = _pick_batch_tile(B, tb_max)
    if bp != B:
        x_flat = jnp.pad(x_flat, ((0, bp - B), (0, 0)))

    d_in = x_flat.shape[1]
    grid = (bp // tb,)

    cost = pl.CostEstimate(
        flops=2 * bp * (d_in * HIDDEN_PAD + 2 * HIDDEN_PAD * HIDDEN_PAD),
        transcendentals=bp * (PADDED_CLASSES + 1),
        bytes_accessed=(bp * d_in * 4 + bp * PADDED_CLASSES * 2
                        + (d_in * HIDDEN_PAD + 2 * HIDDEN_PAD * HIDDEN_PAD) * 2
                        + 3 * HIDDEN_PAD * 4),
    )

    out = pl.pallas_call(
        bpnet_kernel,
        out_shape=jax.ShapeDtypeStruct((bp, PADDED_CLASSES), jnp.bfloat16),
        grid=grid,
        in_specs=[
            pl.BlockSpec((tb, d_in), lambda i: (i, 0)),      # x: streamed per tile (f32)
            pl.BlockSpec(w1b.shape, lambda i: (0, 0)),       # weights/biases: resident
            pl.BlockSpec(b1p.shape, lambda i: (0, 0)),
            pl.BlockSpec(w2b.shape, lambda i: (0, 0)),
            pl.BlockSpec(b2p.shape, lambda i: (0, 0)),
            pl.BlockSpec(w3b.shape, lambda i: (0, 0)),
            pl.BlockSpec(b3p.shape, lambda i: (0, 0)),
        ],
        out_specs=pl.BlockSpec((tb, PADDED_CLASSES), lambda i: (i, 0)),
        compiler_params=pltpu.CompilerParams(
            dimension_semantics=("parallel",)),
        cost_estimate=cost,
    )(x_flat, w1b, b1p, w2b, b2p, w3b, b3p)

    # Drop batch/lane padding (tiny slice: B x 10) and return f32 probs.
    return out[:B, :NUM_CLASSES].astype(jnp.float32)


def bpnet_reference(x_nchw, params):
    """Pure-JAX f32 reference for correctness checking."""
    B = x_nchw.shape[0]
    x = x_nchw.reshape(B, -1).astype(jnp.float32)
    w1, b1, w2, b2, w3, b3 = params
    x = x / jnp.maximum(jnp.sqrt(jnp.sum(x * x, axis=1, keepdims=True)), 1e-12)
    h1 = jnp.maximum(x @ w1 + b1, 0.0)
    h2 = jnp.maximum(h1 @ w2 + b2, 0.0)
    logits = h2 @ w3 + b3
    return jax.nn.softmax(logits, axis=1)


def init_params(key):
    """Deterministic init matching nn.Linear shapes (weights stored transposed)."""
    def linear(key, fan_in, fan_out):
        kw, kb = jax.random.split(key)
        bound = 1.0 / jnp.sqrt(fan_in)
        w = jax.random.uniform(kw, (fan_in, fan_out), jnp.float32, -bound, bound)
        b = jax.random.uniform(kb, (1, fan_out), jnp.float32, -bound, bound)
        return w, b

    k1, k2, k3 = jax.random.split(key, 3)
    w1, b1 = linear(k1, IN_FEATURES, HIDDEN)
    w2, b2 = linear(k2, HIDDEN, HIDDEN)
    w3, b3 = linear(k3, HIDDEN, NUM_CLASSES)
    return (w1, b1, w2, b2, w3, b3)


# TODO(synk): training-side pieces (Adam optimizer, CrossEntropyLoss backward,
# train/accuracy loops, torch.save, feature visualization) are host-side /
# autograd code with no single-kernel Pallas equivalent; only the forward pass
# is implemented.

if __name__ == "__main__":
    key = jax.random.PRNGKey(0)
    k_params, k_x = jax.random.split(key)

    params = init_params(k_params)
    prepped = prepare_params(params)   # one-time padding + bf16 casts
    x = jax.random.normal(k_x, (2, 1, 28, 28), jnp.float32)   # batch=2, MNIST-sized

    probs = bpnet_forward(x, prepped)
    probs = jax.block_until_ready(probs)

    assert probs.shape == (2, NUM_CLASSES)
    # sanity: softmax rows sum to ~1 (bf16 output store -> loose-ish tol)
    assert bool(jnp.all(jnp.abs(jnp.sum(probs, axis=1) - 1.0) < 1e-2))
    # sanity: matches pure-JAX f32 reference within bf16 tolerance
    ref = bpnet_reference(x, params)
    assert bool(jnp.max(jnp.abs(probs - ref)) < 5e-2)
    print("KERNEL_OK")
</pallas_src>

<mosaic_0001>
module attributes {stable_mosaic.version = 11 : i64} {
  func.func @bpnet_kernel(%arg0: i32, %arg1: memref<8x784xf32, #tpu.memory_space<vmem>>, %arg2: memref<784x128xbf16, #tpu.memory_space<vmem>>, %arg3: memref<1x128xf32, #tpu.memory_space<vmem>>, %arg4: memref<128x128xbf16, #tpu.memory_space<vmem>>, %arg5: memref<1x128xf32, #tpu.memory_space<vmem>>, %arg6: memref<128x128xbf16, #tpu.memory_space<vmem>>, %arg7: memref<1x128xf32, #tpu.memory_space<vmem>>, %arg8: memref<8x128xbf16, #tpu.memory_space<vmem>>) attributes {dimension_semantics = [#tpu.dimension_semantics<parallel>], iteration_bounds = array<i64: 1>, scalar_prefetch = 0 : i64, scratch_operands = 0 : i64, tpu.core_type = #tpu.core_type<tc>, window_params = [{transform_indices = @transform_0, window_bounds = array<i64: 8, 784>}, {pipeline_mode = #tpu.pipeline_mode<synchronous>, transform_indices = @transform_1, window_bounds = array<i64: 784, 128>}, {pipeline_mode = #tpu.pipeline_mode<synchronous>, transform_indices = @transform_2, window_bounds = array<i64: 1, 128>}, {pipeline_mode = #tpu.pipeline_mode<synchronous>, transform_indices = @transform_3, window_bounds = array<i64: 128, 128>}, {pipeline_mode = #tpu.pipeline_mode<synchronous>, transform_indices = @transform_4, window_bounds = array<i64: 1, 128>}, {pipeline_mode = #tpu.pipeline_mode<synchronous>, transform_indices = @transform_5, window_bounds = array<i64: 128, 128>}, {pipeline_mode = #tpu.pipeline_mode<synchronous>, transform_indices = @transform_6, window_bounds = array<i64: 1, 128>}, {transform_indices = @transform_7, window_bounds = array<i64: 8, 128>}]} {
    %c0 = arith.constant 0 : index
    %c0_0 = arith.constant 0 : index
    %0 = vector.load %arg1[%c0, %c0_0] : memref<8x784xf32, #tpu.memory_space<vmem>>, vector<8x784xf32>
    %1 = arith.mulf %0, %0 : vector<8x784xf32>
    %cst = arith.constant dense<0.000000e+00> : vector<8xf32>
    %2 = vector.multi_reduction <add>, %1, %cst [1] : vector<8x784xf32> to vector<8xf32>
    %3 = vector.shape_cast %2 : vector<8xf32> to vector<8x1xf32>
    %cst_1 = arith.constant 1.000000e-24 : f32
    %4 = vector.broadcast %cst_1 : f32 to vector<8x1xf32>
    %5 = arith.maximumf %3, %4 : vector<8x1xf32>
    %6 = math.rsqrt %5 : vector<8x1xf32>
    %7 = vector.broadcast %6 : vector<8x1xf32> to vector<8x784xf32>
    %8 = arith.mulf %0, %7 : vector<8x784xf32>
    %9 = arith.truncf %8 : vector<8x784xf32> to vector<8x784xbf16>
    %c0_2 = arith.constant 0 : index
    %c0_3 = arith.constant 0 : index
    %10 = vector.load %arg2[%c0_2, %c0_3] : memref<784x128xbf16, #tpu.memory_space<vmem>>, vector<784x128xbf16>
    %cst_4 = arith.constant dense<0.000000e+00> : vector<8x128xf32>
    %11 = tpu.matmul %9, %10, %cst_4 {dimension_numbers = #tpu.dot_dimension_numbers<[1], [0], [0], [1], [0, 0, 1, 1], [], []>} : vector<8x784xbf16>, vector<784x128xbf16>, vector<8x128xf32> -> vector<8x128xf32>
    %c0_5 = arith.constant 0 : index
    %c0_6 = arith.constant 0 : index
    %12 = vector.load %arg3[%c0_5, %c0_6] : memref<1x128xf32, #tpu.memory_space<vmem>>, vector<1x128xf32>
    %13 = vector.broadcast %12 : vector<1x128xf32> to vector<8x128xf32>
    %14 = arith.addf %11, %13 : vector<8x128xf32>
    %cst_7 = arith.constant 0.000000e+00 : f32
    %15 = vector.broadcast %cst_7 : f32 to vector<8x128xf32>
    %16 = arith.maximumf %14, %15 : vector<8x128xf32>
    %17 = arith.truncf %16 : vector<8x128xf32> to vector<8x128xbf16>
    %c0_8 = arith.constant 0 : index
    %c0_9 = arith.constant 0 : index
    %18 = vector.load %arg4[%c0_8, %c0_9] : memref<128x128xbf16, #tpu.memory_space<vmem>>, vector<128x128xbf16>
    %cst_10 = arith.constant dense<0.000000e+00> : vector<8x128xf32>
    %19 = tpu.matmul %17, %18, %cst_10 {dimension_numbers = #tpu.dot_dimension_numbers<[1], [0], [0], [1], [0, 0, 1, 1], [], []>} : vector<8x128xbf16>, vector<128x128xbf16>, vector<8x128xf32> -> vector<8x128xf32>
    %c0_11 = arith.constant 0 : index
    %c0_12 = arith.constant 0 : index
    %20 = vector.load %arg5[%c0_11, %c0_12] : memref<1x128xf32, #tpu.memory_space<vmem>>, vector<1x128xf32>
    %21 = vector.broadcast %20 : vector<1x128xf32> to vector<8x128xf32>
    %22 = arith.addf %19, %21 : vector<8x128xf32>
    %cst_13 = arith.constant 0.000000e+00 : f32
    %23 = vector.broadcast %cst_13 : f32 to vector<8x128xf32>
    %24 = arith.maximumf %22, %23 : vector<8x128xf32>
    %25 = arith.truncf %24 : vector<8x128xf32> to vector<8x128xbf16>
    %c0_14 = arith.constant 0 : index
    %c0_15 = arith.constant 0 : index
    %26 = vector.load %arg6[%c0_14, %c0_15] : memref<128x128xbf16, #tpu.memory_space<vmem>>, vector<128x128xbf16>
    %cst_16 = arith.constant dense<0.000000e+00> : vector<8x128xf32>
    %27 = tpu.matmul %25, %26, %cst_16 {dimension_numbers = #tpu.dot_dimension_numbers<[1], [0], [0], [1], [0, 0, 1, 1], [], []>} : vector<8x128xbf16>, vector<128x128xbf16>, vector<8x128xf32> -> vector<8x128xf32>
    %c0_17 = arith.constant 0 : index
    %c0_18 = arith.constant 0 : index
    %28 = vector.load %arg7[%c0_17, %c0_18] : memref<1x128xf32, #tpu.memory_space<vmem>>, vector<1x128xf32>
    %29 = vector.broadcast %28 : vector<1x128xf32> to vector<8x128xf32>
    %30 = arith.addf %27, %29 : vector<8x128xf32>
    %cst_19 = arith.constant dense<0xFF800000> : vector<8xf32>
    %31 = vector.multi_reduction <maximumf>, %30, %cst_19 [1] : vector<8x128xf32> to vector<8xf32>
    %32 = vector.shape_cast %31 : vector<8xf32> to vector<8x1xf32>
    %33 = vector.broadcast %32 : vector<8x1xf32> to vector<8x128xf32>
    %34 = arith.subf %30, %33 : vector<8x128xf32>
    %35 = math.exp %34 : vector<8x128xf32>
    %cst_20 = arith.constant dense<0.000000e+00> : vector<8xf32>
    %36 = vector.multi_reduction <add>, %35, %cst_20 [1] : vector<8x128xf32> to vector<8xf32>
    %37 = vector.shape_cast %36 : vector<8xf32> to vector<8x1xf32>
    %38 = vector.broadcast %37 : vector<8x1xf32> to vector<8x128xf32>
    %39 = arith.divf %35, %38 : vector<8x128xf32>
    %40 = arith.truncf %39 : vector<8x128xf32> to vector<8x128xbf16>
    %c0_21 = arith.constant 0 : index
    %c0_22 = arith.constant 0 : index
    %41 = vector.load %arg8[%c0_21, %c0_22] : memref<8x128xbf16, #tpu.memory_space<vmem>>, vector<8x128xbf16>
    tpu.vector_store %arg8[%c0_21, %c0_22], %40 {strides = array<i32>} : memref<8x128xbf16, #tpu.memory_space<vmem>>, vector<8x128xbf16>,
    return
  }
  func.func @transform_0(%arg0: i32) -> (i32, i32) {
    %c0_i32 = arith.constant 0 : i32
    %c0_i32_0 = arith.constant 0 : i32
    return %arg0, %c0_i32 : i32, i32
  }
  func.func @transform_1(%arg0: i32) -> (i32, i32) {
    %c0_i32 = arith.constant 0 : i32
    %c0_i32_0 = arith.constant 0 : i32
    %c0_i32_1 = arith.constant 0 : i32
    return %c0_i32, %c0_i32_0 : i32, i32
  }
  func.func @transform_2(%arg0: i32) -> (i32, i32) {
    %c0_i32 = arith.constant 0 : i32
    %c0_i32_0 = arith.constant 0 : i32
    %c0_i32_1 = arith.constant 0 : i32
    return %c0_i32, %c0_i32_0 : i32, i32
  }
  func.func @transform_3(%arg0: i32) -> (i32, i32) {
    %c0_i32 = arith.constant 0 : i32
    %c0_i32_0 = arith.constant 0 : i32
    %c0_i32_1 = arith.constant 0 : i32
    return %c0_i32, %c0_i32_0 : i32, i32
  }
  func.func @transform_4(%arg0: i32) -> (i32, i32) {
    %c0_i32 = arith.constant 0 : i32
    %c0_i32_0 = arith.constant 0 : i32
    %c0_i32_1 = arith.constant 0 : i32
    return %c0_i32, %c0_i32_0 : i32, i32
  }
  func.func @transform_5(%arg0: i32) -> (i32, i32) {
    %c0_i32 = arith.constant 0 : i32
    %c0_i32_0 = arith.constant 0 : i32
    %c0_i32_1 = arith.constant 0 : i32
    return %c0_i32, %c0_i32_0 : i32, i32
  }
  func.func @transform_6(%arg0: i32) -> (i32, i32) {
    %c0_i32 = arith.constant 0 : i32
    %c0_i32_0 = arith.constant 0 : i32
    %c0_i32_1 = arith.constant 0 : i32
    return %c0_i32, %c0_i32_0 : i32, i32
  }
  func.func @transform_7(%arg0: i32) -> (i32, i32) {
    %c0_i32 = arith.constant 0 : i32
    %c0_i32_0 = arith.constant 0 : i32
    return %arg0, %c0_i32 : i32, i32
  }
}

</mosaic_0001>

<bundles_post_ra>
// kernel: tpu_custom_call.1
= control target key start
LH: loop header
LB: loop body
LE: loop exit
PB: predicated region body
PF: predicated region fallthrough
CT: control target
= control target key end

     0   :  { %12 = vsyncpa [#allocation3], 0  ;;  %s1468_s0 = inlined_call_operand.hbm [shape: f32[8,784], index: 0, kind: input, shape index: {}]   ;;  %s1469_s1 = inlined_call_operand.hbm [shape: bf16[784,128], index: 1, kind: input, shape index: {}]   ;;  %s1470_s2 = inlined_call_operand.vmem [shape: f32[1,128], index: 2, kind: input, shape index: {}]   ;;  %s1471_s3 = inlined_call_operand.hbm [shape: bf16[128,128], index: 3, kind: input, shape index: {}]   ;;  %s1472_s4 = inlined_call_operand.vmem [shape: f32[1,128], index: 4, kind: input, shape index: {}]   ;;  %s1473_s5 = inlined_call_operand.hbm [shape: bf16[128,128], index: 5, kind: input, shape index: {}]   ;;  %s1474_s6 = inlined_call_operand.vmem [shape: f32[1,128], index: 6, kind: input, shape index: {}]   ;;  %s1475_s7 = inlined_call_operand.hbm [shape: bf16[8,128], index: 7, kind: output, shape index: {}]  }
   0x1   :  { %13 = vsyncpa [#allocation6], 0 }
   0x2   :  { %14 = vsyncpa [#allocation9], 0 }
   0x3   :  { %15 = vsyncpa [#allocation4], 0  ;;  %s1326_s24 = smov [#allocation5]  }
   0x4   :  { %s31_s25 = sshll.u32 %s1326_s24, 4  ;;  %s32_s25 = int_to_ptr.vmem [resolvable:$true] %s31_s25 }
   0x5   :  { %s1226_s26 = scalar_lea.vmem %s32_s25, 6272  ;;  %p1231_p1 = scmp.lt.s32.totalorder %s32_s25, %s32_s25 }
   0x6   :  { %p1227_p0 = scmp.ne.s32.totalorder %s32_s25, %s1226_s26  ;;  %p1232_p2 = scmp.lt.s32.totalorder %s1226_s26, %s1226_s26 }
   0x8   :  { %p1233_p3 = por %p1232_p2, %p1231_p1 }
   0xa   :  { %p1234_p4 = pnand %p1233_p3, %p1227_p0 }
   0xc   :  { %1237 = shalt.err (!%p1234_p4)
}
   0xd   :  { %s1327_s27 = smov 64   ;;  %s1328_s28 = smov 4  }
   0xe   :  { %37 = dma.hbm_to_vmem [thread:$0]  %s1469_s1, 6272, %s32_s25, [#allocation6], %s1327_s27, %s1327_s27, %s1328_s28  }
   0xf   :  { %s1329_s8 = smov [#allocation2]   ;;  %s1330_s10 = smov [#allocation7]  }
  0x10   :  { %s22_s9 = sshll.u32 %s1329_s8, 4  ;;  %s45_s11 = sshll.u32 %s1330_s10, 4  ;;  %s23_s9 = int_to_ptr.vmem [resolvable:$true] %s22_s9  ;;  %s46_s11 = int_to_ptr.vmem [resolvable:$true] %s45_s11 }
  0x11   :  { %s1246_s12 = scalar_lea.vmem %s23_s9, 896  ;;  %p1251_p6 = scmp.lt.s32.totalorder %s23_s9, %s23_s9 }
  0x12   :  { %p1247_p5 = scmp.ne.s32.totalorder %s23_s9, %s1246_s12  ;;  %p1252_p7 = scmp.lt.s32.totalorder %s1246_s12, %s1246_s12 }
  0x14   :  { %p1253_p8 = por %p1252_p7, %p1251_p6 }
  0x16   :  { %p1254_p9 = pnand %p1253_p8, %p1247_p5 }
  0x18   :  { %1257 = shalt.err (!%p1254_p9)
}
  0x19   :  { %25 = dma.hbm_to_vmem [thread:$0]  %s1468_s0, 896, %s23_s9, [#allocation3]  }
  0x1a   :  { %s1266_s15 = scalar_lea.vmem %s46_s11, 1024  ;;  %p1271_p11 = scmp.lt.s32.totalorder %s46_s11, %s46_s11 }
  0x1b   :  { %p1267_p10 = scmp.ne.s32.totalorder %s46_s11, %s1266_s15  ;;  %p1272_p12 = scmp.lt.s32.totalorder %s1266_s15, %s1266_s15 }
  0x1d   :  { %p1273_p13 = por %p1272_p12, %p1271_p11 }
  0x1f   :  { %p1274_p0 = pnand %p1273_p13, %p1267_p10 }
  0x21   :  { %1277 = shalt.err (!%p1274_p0)
}
  0x22   :  { %51 = dma.hbm_to_vmem [thread:$0]  %s1471_s3, 1024, %s46_s11, [#allocation6], %s1327_s27, %s1327_s27, %s1328_s28  }
  0x23   :  { %s1331_s17 = smov [#allocation8]  }
  0x24   :  { %s59_s18 = sshll.u32 %s1331_s17, 4  ;;  %s60_s18 = int_to_ptr.vmem [resolvable:$true] %s59_s18 }
  0x25   :  { %s1286_s19 = scalar_lea.vmem %s60_s18, 1024  ;;  %p1291_p2 = scmp.lt.s32.totalorder %s60_s18, %s60_s18 }
  0x26   :  { %p1287_p1 = scmp.ne.s32.totalorder %s60_s18, %s1286_s19  ;;  %p1292_p3 = scmp.lt.s32.totalorder %s1286_s19, %s1286_s19 }
  0x28   :  { %p1293_p4 = por %p1292_p3, %p1291_p2 }
  0x2a   :  { %p1294_p5 = pnand %p1293_p4, %p1287_p1 }
  0x2c   :  { %1297 = shalt.err (!%p1294_p5)
}
  0x2d   :  { %65 = dma.hbm_to_vmem [thread:$0]  %s1473_s5, 1024, %s60_s18, [#allocation9], %s1327_s27, %s1327_s27, %s1328_s28  }
  0x2e   :  { %1318 = dma.done.wait [#allocation3], 896  }
  0x2f   :  { %1319 = vsyncadd [#allocation3], 4294966400 }
  0x30   :  { %1320 = dma.done.wait [#allocation6], 7296  }
  0x31   :  { %1321 = vsyncadd [#allocation6], 4294960000 }
  0x32   :  { %1322 = dma.done.wait [#allocation9], 1024  }
  0x33   :  { %1323 = vsyncadd [#allocation9], 4294966272  ;;  %v1396_v0 = vld [vmem:[#allocation2] sm:$0xff]  ;;  %v1398_v1 = vld [vmem:[#allocation2 + $0x8] sm:$0xff]  ;;  %vm100_vm0 = vcmask 130048   ;;  %v1332_v54 = vmov 0.0  }
  0x34   :  { %v1400_v2 = vld [vmem:[#allocation2 + $0x10] sm:$0xff]  ;;  %v1402_v3 = vld [vmem:[#allocation2 + $0x18] sm:$0xff]  ;;  %v1404_v4 = vld [vmem:[#allocation2 + $0x20] sm:$0xff]  ;;  %v88_v5 = vmul.f32 %v1396_v0, %v1396_v0  ;;  %v89_v6 = vmul.f32 %v1398_v1, %v1398_v1  ;;  %vm1333_vm1 = vmmov 0  }
  0x35   :  { %v90_v7 = vmul.f32 %v1400_v2, %v1400_v2  ;;  %v1412_v8 = vld [vmem:[#allocation2 + $0x28] sm:$0xff]  ;;  %v1414_v9 = vld [vmem:[#allocation2 + $0x30] sm:$0xff]  ;;  %v91_v10 = vmul.f32 %v1402_v3, %v1402_v3  ;;  %v92_v14 = vmul.f32 %v1404_v4, %v1404_v4  ;;  %v1155_v28 = vld [vmem:[#allocation5 + $0x68] sm:$0xff]  }
  0x36   :  { %v95_v11 = vadd.f32 %v89_v6, %v88_v5  ;;  %v1147_v12 = vld [vmem:[#allocation5 + $0x78] sm:$0xff]   ;;  %v94_v17 = vmul.f32 %v1414_v9, %v1414_v9  ;;  %v93_v19 = vmul.f32 %v1412_v8, %v1412_v8  ;;  %v1151_v21 = vld [vmem:[#allocation5 + $0x70] sm:$0xff]   ;;  %v1156_v29 = vld [vmem:[#allocation5 + $0x28] sm:$0xff]  }
  0x37   :  { %v1148_v13 = vld [vmem:[#allocation5 + $0x38] sm:$0xff]   ;;  %1006 = vmatprep.subr.bf16.mxu0 %v1147_v12  ;;  %v1152_v22 = vld [vmem:[#allocation5 + $0x30] sm:$0xff]   ;;  %v1157_v31 = vld [vmem:[#allocation5 + $0xe8] sm:$0xff]  }
  0x38   :  { %v96_v15 = vadd.f32 %v95_v11, %v90_v7  ;;  %v1149_v16 = vld [vmem:[#allocation5 + $0xf8] sm:$0xff]   ;;  %1007 = vmatpush3.bf16.msra.mxu0 %v1148_v13  ;;  %v1153_v24 = vld [vmem:[#allocation5 + $0xf0] sm:$0xff]   ;;  %v101_v25 = vsel %vm100_vm0, %v94_v17, 0.0  ;;  %v1158_v32 = vld [vmem:[#allocation5 + $0xa8] sm:$0xff]  }
  0x39   :  { %v1150_v18 = vld [vmem:[#allocation5 + $0xb8] sm:$0xff]   ;;  %1028 = vmatprep.subr.bf16.mxu1 %v1149_v16  ;;  %1008 = vmatprep.subr.bf16.mxu0 %v1151_v21  ;;  %v1154_v26 = vld [vmem:[#allocation5 + $0xb0] sm:$0xff]   ;;  %v1159_v33 = vld [vmem:[#allocation5 + $0x60] sm:$0xff]  }
  0x3a   :  { %v97_v20 = vadd.f32 %v96_v15, %v91_v10  ;;  %1029 = vmatpush3.bf16.msra.mxu1 %v1150_v18  ;;  %v1160_v34 = vld [vmem:[#allocation5 + $0x20] sm:$0xff]   ;;  %v1163_v37 = vld [vmem:[#allocation5 + $0x58] sm:$0xff]   ;;  %v1167_v41 = vld [vmem:[#allocation5 + $0x50] sm:$0xff]  }
  0x3b   :  { %1030 = vmatprep.subr.bf16.mxu1 %v1153_v24  ;;  %v1161_v35 = vld [vmem:[#allocation5 + $0xe0] sm:$0xff]   ;;  %v1164_v38 = vld [vmem:[#allocation5 + $0x18] sm:$0xff]   ;;  %v1169_v42 = vld [vmem:[#allocation5 + $0xd0] sm:$0xff]  }
  0x3c   :  { %v98_v23 = vadd.f32 %v97_v20, %v92_v14  ;;  %1009 = vmatpush3.bf16.msra.mxu0 %v1152_v22  ;;  %v1162_v36 = vld [vmem:[#allocation5 + $0xa0] sm:$0xff]   ;;  %v1165_v39 = vld [vmem:[#allocation5 + $0xd8] sm:$0xff]   ;;  %v1168_v43 = vld [vmem:[#allocation5 + $0x10] sm:$0xff]  }
  0x3d   :  { %1010 = vmatprep.subr.bf16.mxu0 %v1155_v28  ;;  %v1166_v40 = vld [vmem:[#allocation5 + $0x98] sm:$0xff]   ;;  %v1170_v44 = vld [vmem:[#allocation5 + $0x90] sm:$0xff]   ;;  %v1171_v45 = vld [vmem:[#allocation5 + $0x48] sm:$0xff]  }
  0x3e   :  { %v99_v27 = vadd.f32 %v98_v23, %v93_v19  ;;  %1031 = vmatpush3.bf16.msra.mxu1 %v1154_v26  ;;  %v1172_v46 = vld [vmem:[#allocation5 + $0x8] sm:$0xff]   ;;  %v1175_v49 = vld [vmem:[#allocation5 + $0x40] sm:$0xff]   ;;  %v1179_v53 = vld [vmem:[#allocation5 + $0x178] sm:$0xff]  }
  0x3f   :  { %1032 = vmatprep.subr.bf16.mxu1 %v1157_v31  ;;  %v1173_v47 = vld [vmem:[#allocation5 + $0xc8] sm:$0xff]   ;;  %v1177_v50 = vld [vmem:[#allocation5 + $0xc0] sm:$0xff]   ;;  %v1180_v10 = vld [vmem:[#allocation5 + $0x138] sm:$0xff]  }
  0x40   :  { %v102_v30 = vadd.f32 %v101_v25, %v99_v27  ;;  %1011 = vmatpush3.bf16.msra.mxu0 %v1156_v29  ;;  %v1174_v48 = vld [vmem:[#allocation5 + $0x88] sm:$0xff]   ;;  %v1176_v51 = vld [vmem:[#allocation5] sm:$0xff]   ;;  %v1181_v11 = vld [vmem:[#allocation5 + $0x170] sm:$0xff]  }
  0x41   :  { %1012 = vmatprep.subr.bf16.mxu0 %v1159_v33  ;;  %v1178_v52 = vld [vmem:[#allocation5 + $0x80] sm:$0xff]   ;;  %v1189_v16 = vld [vmem:[#allocation5 + $0x118] sm:$0xff]   ;;  %v1190_v17 = vld [vmem:[#allocation5 + $0x150] sm:$0xff]  }
  0x42   :  { %103 = vadd.xlane.f32.xlu0 %v102_v30  ;;  %1033 = vmatpush3.bf16.msra.mxu1 %v1158_v32  ;;  %v1183_v12 = vld [vmem:[#allocation5 + $0x180] sm:$0xff]   ;;  %v1191_v18 = vld [vmem:[#allocation5 + $0x110] sm:$0xff]   ;;  %v1192_v19 = vld [vmem:[#allocation5 + $0x148] sm:$0xff]  }
  0x43   :  { %1034 = vmatprep.subr.bf16.mxu1 %v1161_v35  ;;  %v1186_v14 = vld [vmem:[#allocation5 + $0x160] sm:$0xff]   ;;  %v1193_v20 = vld [vmem:[#allocation5 + $0x108] sm:$0xff]   ;;  %v1197_v26 = vld [vmem:[#allocation7 + $0x30] sm:$0xff]  }
  0x44   :  { %1013 = vmatpush3.bf16.msra.mxu0 %v1160_v34  ;;  %v1187_v15 = vld [vmem:[#allocation5 + $0x120] sm:$0xff]   ;;  %v1198_v27 = vld [vmem:[#allocation7 + $0x28] sm:$0xff]   ;;  %v1199_v28 = vld [vmem:[#allocation7 + $0x20] sm:$0xff]  }
  0x45   :  { %1014 = vmatprep.subr.bf16.mxu0 %v1163_v37  ;;  %v1194_v21 = vld [vmem:[#allocation5 + $0x140] sm:$0xff]   ;;  %v1201_v29 = vld [vmem:[#allocation7 + $0x10] sm:$0xff]   ;;  %v1202_v30 = vld [vmem:[#allocation7 + $0x8] sm:$0xff]  }
  0x46   :  { %1035 = vmatpush3.bf16.msra.mxu1 %v1162_v36  ;;  %v1195_v22 = vld [vmem:[#allocation5 + $0x100] sm:$0xff]   ;;  %v1203_v31 = vld [vmem:[#allocation7] sm:$0xff]   ;;  %v1205_v33 = vld [vmem:[#allocation8 + $0x30] sm:$0xff]  }
  0x47   :  { %1036 = vmatprep.subr.bf16.mxu1 %v1165_v39  ;;  %v1196_v25 = vld [vmem:[#allocation7 + $0x38] sm:$0xff]   ;;  %v1206_v34 = vld [vmem:[#allocation8 + $0x28] sm:$0xff]   ;;  %v1207_v35 = vld [vmem:[#allocation8 + $0x20] sm:$0xff]  }
  0x48   :  { %1015 = vmatpush3.bf16.msra.mxu0 %v1164_v38  ;;  %v1204_v32 = vld [vmem:[#allocation8 + $0x38] sm:$0xff]   ;;  %v1209_v37 = vld [vmem:[#allocation8 + $0x10] sm:$0xff]  }
  0x49   :  { %1016 = vmatprep.subr.bf16.mxu0 %v1167_v41  ;;  %v1208_v36 = vld [vmem:[#allocation8 + $0x18] sm:$0xff]  }
  0x4a   :  { %1037 = vmatpush3.bf16.msra.mxu1 %v1166_v40 }
  0x4b   :  { %1038 = vmatprep.subr.bf16.mxu1 %v1169_v42 }
  0x4c   :  { %1017 = vmatpush3.bf16.msra.mxu0 %v1168_v43 }
  0x4d   :  { %1018 = vmatprep.subr.bf16.mxu0 %v1171_v45 }
  0x4e   :  { %1039 = vmatpush3.bf16.msra.mxu1 %v1170_v44 }
  0x4f   :  { %1040 = vmatprep.subr.bf16.mxu1 %v1173_v47 }
  0x50   :  { %1019 = vmatpush3.bf16.msra.mxu0 %v1172_v46 }
  0x51   :  { %1020 = vmatprep.subr.bf16.mxu0 %v1175_v49 }
  0x52   :  { %1041 = vmatpush3.bf16.msra.mxu1 %v1174_v48 }
  0x53   :  { %1042 = vmatprep.subr.bf16.mxu1 %v1177_v50 }
  0x54   :  { %1021 = vmatpush3.bf16.msra.mxu0 %v1176_v51  ;;  %v937_v51 = vld [vmem:[%s1470_s2] ss:$0 sm:$0xff] }
  0x55   :  { %1050 = vmatprep.subr.bf16.mxu0 %v1179_v53 }
  0x56   :  { %1043 = vmatpush3.bf16.msra.mxu1 %v1178_v52 }
  0x57   :  { %1092 = vmatprep.subr.bf16.mxu1 %v1332_v54 }
  0xcb   :  { %v104_v55 = vpop.xlane.xlu0 %103 }
  0xcc   :  { %v105_v56 = vmax.f32 %v104_v55, 1e-24 }
  0xce   :  { %1212 = vrsqrt.f32 %v105_v56 }
  0xdb   :  { %v1213_v57 = vpop.eup %1212 }
  0xdc   :  { %v108_v58 = vmul.f32 %v1213_v57, %v1398_v1  ;;  %v110_v59 = vmul.f32 %v1213_v57, %v1402_v3  ;;  %v107_v60 = vmul.f32 %v1213_v57, %v1396_v0  ;;  %v109_v61 = vmul.f32 %v1213_v57, %v1400_v2  ;;  %v1182_v1 = vld [vmem:[#allocation5 + $0x130] sm:$0xff]   ;;  %v1184_v0 = vld [vmem:[#allocation5 + $0x168] sm:$0xff]  }
  0xdd   :  { %v112_v62 = vmul.f32 %v1213_v57, %v1412_v8  ;;  %v113_v2 = vmul.f32 %v1213_v57, %v1414_v9  ;;  %v1185_v3 = vld [vmem:[#allocation5 + $0x128] sm:$0xff]   ;;  %v1188_v9 = vld [vmem:[#allocation5 + $0x158] sm:$0xff]   ;;  %v111_v23 = vmul.f32 %v1213_v57, %v1404_v4  ;;  %v1200_v4 = vld [vmem:[#allocation7 + $0x18] sm:$0xff]  }
  0xde   :  { %v115_v63 = vpack.c.bf16 %v108_v58, %v108_v58  ;;  %v117_v5 = vpack.c.bf16 %v110_v59, %v110_v59  ;;  %v114_v6 = vpack.c.bf16 %v107_v60, %v107_v60  ;;  %v116_v7 = vpack.c.bf16 %v109_v61, %v109_v61 }
  0xdf   :  { %v119_v13 = vpack.c.bf16 %v112_v62, %v112_v62  ;;  %v120_v8 = vpack.c.bf16 %v113_v2, %v113_v2  ;;  %v118_v24 = vpack.c.bf16 %v111_v23, %v111_v23 }
  0xe0   :  { %555 = vmatprep.mubr.bf16.mxu0 %v115_v63  ;;  %595 = vmatprep.mubr.bf16.mxu1 %v117_v5 }
  0xe1   :  { %556 = vmatmul.mubr.bf16.vlgmr.msra.gmra.mxu0 %v114_v6  ;;  %596 = vmatmul.mubr.bf16.vlgmr.msra.gmra.mxu1 %v116_v7  ;;  %v1210_v6 = vld [vmem:[#allocation8 + $0x8] sm:$0xff]   ;;  %v1211_v7 = vld [vmem:[#allocation8] sm:$0xff]  }
  0xe2   :  { %1051 = vmatpush3.bf16.msra.mxu0 %v1180_v10  ;;  %635 = vmatprep.mubr.bf16.mxu0 %v119_v13  ;;  %v988_v10 = vld [vmem:[%s1472_s4] ss:$0 sm:$0xff]  ;;  %s1334_s4 = smov [#allocation10]  }
  0xe3   :  { %1052 = vmatprep.subr.bf16.mxu0 %v1181_v11  ;;  %1093 = vmatpush3.bf16.msra.mxu1 %v1183_v12  ;;  %s926_s24 = sshll.u32 %s1334_s4, 4  ;;  %s927_s24 = int_to_ptr.vmem [resolvable:$true] %s926_s24 }
  0xe4   :  { %1094 = vmatprep.mubr.msk.bf16.mxu1 %vm1333_vm1, %v1332_v54  ;;  %1098 = vmatprep.subr.bf16.mxu1 %v1332_v54  ;;  %p1303_p7 = scmp.lt.s32.totalorder %s927_s24, %s927_s24 }
  0xe6   :  { %1053 = vmatpush3.bf16.msra.mxu0 %v1182_v1 }
  0xe7   :  { %1054 = vmatprep.subr.bf16.mxu0 %v1184_v0 }
  0xe9   :  { %1095 = vmatmul.mubr.msk.bf16.vlgmr.msra.gmra.mxu1 %vm100_vm0, %v120_v8  ;;  %v997_v8 = vld [vmem:[%s1474_s6] ss:$0 sm:$0xff]  ;;  %s1298_s6 = scalar_lea.vmem %s927_s24, 64 }
  0xea   :  { %1055 = vmatpush3.bf16.msra.mxu0 %v1185_v3  ;;  %1114 = vmatprep.mubr.msk.bf16.mxu1 %vm1333_vm1, %v1332_v54  ;;  %p1299_p6 = scmp.ne.s32.totalorder %s927_s24, %s1298_s6  ;;  %p1304_p8 = scmp.lt.s32.totalorder %s1298_s6, %s1298_s6 }
  0xeb   :  { %1056 = vmatprep.subr.bf16.mxu0 %v1186_v14  ;;  %1099 = vmatpush3.bf16.msra.mxu1 %v1196_v25 }
  0xec   :  { %1100 = vmatprep.subr.bf16.mxu1 %v1332_v54  ;;  %p1305_p9 = por %p1304_p8, %p1303_p7 }
  0xee   :  { %1057 = vmatpush3.bf16.msra.mxu0 %v1187_v15  ;;  %p1306_p10 = pnand %p1305_p9, %p1299_p6 }
  0xef   :  { %1058 = vmatprep.subr.bf16.mxu0 %v1188_v9  ;;  %1101 = vmatpush3.bf16.msra.mxu1 %v1197_v26 }
  0xf0   :  { %1102 = vmatprep.subr.bf16.mxu1 %v1332_v54 }
  0xf2   :  { %1059 = vmatpush3.bf16.msra.mxu0 %v1189_v16 }
  0xf3   :  { %1060 = vmatprep.subr.bf16.mxu0 %v1190_v17  ;;  %1103 = vmatpush3.bf16.msra.mxu1 %v1198_v27 }
  0xf4   :  { %1104 = vmatprep.subr.bf16.mxu1 %v1332_v54 }
  0xf6   :  { %1061 = vmatpush3.bf16.msra.mxu0 %v1191_v18 }
  0xf7   :  { %1062 = vmatprep.subr.bf16.mxu0 %v1192_v19  ;;  %1105 = vmatpush3.bf16.msra.mxu1 %v1199_v28 }
  0xf8   :  { %1106 = vmatprep.subr.bf16.mxu1 %v1332_v54 }
  0xfa   :  { %1063 = vmatpush3.bf16.msra.mxu0 %v1193_v20 }
  0xfb   :  { %1064 = vmatprep.subr.bf16.mxu0 %v1194_v21  ;;  %1107 = vmatpush3.bf16.msra.mxu1 %v1200_v4 }
  0xfc   :  { %1108 = vmatprep.subr.bf16.mxu1 %v1332_v54 }
  0xfe   :  { %1065 = vmatpush3.bf16.msra.mxu0 %v1195_v22 }
  0xff   :  { %1118 = vmatprep.subr.bf16.mxu0 %v1332_v54  ;;  %1109 = vmatpush3.bf16.msra.mxu1 %v1201_v29 }
 0x100   :  { %1110 = vmatprep.subr.bf16.mxu1 %v1332_v54 }
 0x101   :  { %636 = vmatmul.mubr.bf16.vlgmr.msra.gmra.mxu0 %v118_v24 }
 0x102   :  { %1134 = vmatprep.mubr.msk.bf16.mxu0 %vm1333_vm1, %v1332_v54  ;;  %1119 = vmatpush3.bf16.msra.mxu0 %v1204_v32 }
 0x103   :  { %1111 = vmatpush3.bf16.msra.mxu1 %v1202_v30  ;;  %1120 = vmatprep.subr.bf16.mxu0 %v1332_v54 }
 0x104   :  { %1112 = vmatprep.subr.bf16.mxu1 %v1332_v54 }
 0x106   :  { %1121 = vmatpush3.bf16.msra.mxu0 %v1205_v33 }
 0x107   :  { %1113 = vmatpush3.bf16.msra.mxu1 %v1203_v31  ;;  %1122 = vmatprep.subr.bf16.mxu0 %v1332_v54 }
 0x10a   :  { %1123 = vmatpush3.bf16.msra.mxu0 %v1206_v34 }
 0x10b   :  { %1124 = vmatprep.subr.bf16.mxu0 %v1332_v54 }
 0x10e   :  { %1125 = vmatpush3.bf16.msra.mxu0 %v1207_v35 }
 0x10f   :  { %1126 = vmatprep.subr.bf16.mxu0 %v1332_v54 }
 0x112   :  { %1127 = vmatpush3.bf16.msra.mxu0 %v1208_v36 }
 0x113   :  { %1128 = vmatprep.subr.bf16.mxu0 %v1332_v54 }
 0x116   :  { %1129 = vmatpush3.bf16.msra.mxu0 %v1209_v37 }
 0x117   :  { %1130 = vmatprep.subr.bf16.mxu0 %v1332_v54 }
 0x11a   :  { %1131 = vmatpush3.bf16.msra.mxu0 %v1210_v6 }
 0x11b   :  { %1132 = vmatprep.subr.bf16.mxu0 %v1332_v54 }
 0x11e   :  { %1133 = vmatpush3.bf16.msra.mxu0 %v1211_v7 }
 0x1a1   :  { %v1022_v38 = vpop.f32.mrf.mxu0  ;;  %v1044_v39 = vpop.f32.mrf.mxu1 }
 0x1a3   :  { %v1023_v40 = vpop.f32.mrf.mxu0  ;;  %v1045_v41 = vpop.f32.mrf.mxu1 }
 0x1a4   :  { %v1024_v50 = vadd.f32 %v1023_v40, %v1022_v38  ;;  %v1046_v55 = vadd.f32 %v1045_v41, %v1044_v39 }
 0x1a5   :  { %v1025_v42 = vpop.f32.mrf.mxu0  ;;  %v1047_v43 = vpop.f32.mrf.mxu1 }
 0x1a6   :  { %v558_v52 = vadd.f32 %v1024_v50, %v937_v51 }
 0x1a7   :  { %v1026_v44 = vpop.f32.mrf.mxu0  ;;  %v1048_v45 = vpop.f32.mrf.mxu1 }
 0x1a8   :  { %v598_v57 = vadd.f32 %v1046_v55, %v558_v52 }
 0x1a9   :  { %v677_v46 = vpop.f32.mrf.mxu1 }
 0x1ab   :  { %v1096_v47 = vpop.f32.mrf.mxu1 }
 0x1ad   :  { %v680_v48 = vpop.f32.mrf.mxu1 }
 0x1af   :  { %v1097_v49 = vpop.f32.mrf.mxu1 }
 0x1c1   :  { %v1066_v53 = vpop.f32.mrf.mxu0 }
 0x1c3   :  { %v1067_v56 = vpop.f32.mrf.mxu0 }
 0x1c4   :  { %v1068_v58 = vadd.f32 %v1067_v56, %v1066_v53 }
 0x1c5   :  { %v1069_v59 = vpop.f32.mrf.mxu0 }
 0x1c6   :  { %v638_v60 = vadd.f32 %v1068_v58, %v598_v57 }
 0x1c7   :  { %v1070_v61 = vpop.f32.mrf.mxu0 }
 0x1c8   :  { %v678_v62 = vadd.f32 %v677_v46, %v638_v60 }
 0x1ca   :  { %v683_v63 = vmax.f32 %v678_v62, 0.0 }
 0x1cc   :  { %v684_v5 = vpack.c.bf16 %v683_v63, %v683_v63 }
 0x1ce   :  { %1115 = vmatmul.mubr.bf16.vlgmr.msra.gmra.mxu1 %v684_v5 }
 0x28e   :  { %v790_v11 = vpop.f32.mrf.mxu1 }
 0x28f   :  { %v791_v12 = vadd.f32 %v988_v10, %v790_v11 }
 0x290   :  { %v1116_v13 = vpop.f32.mrf.mxu1 }
 0x291   :  { %v796_v1 = vmax.f32 %v791_v12, 0.0 }
 0x292   :  { %v793_v0 = vpop.f32.mrf.mxu1 }
 0x293   :  { %v797_v2 = vpack.c.bf16 %v796_v1, %v796_v1 }
 0x294   :  { %v1117_v3 = vpop.f32.mrf.mxu1 }
 0x295   :  { %1135 = vmatmul.mubr.bf16.vlgmr.msra.gmra.mxu0 %v797_v2 }
 0x355   :  { %v903_v14 = vpop.f32.mrf.mxu0 }
 0x356   :  { %v904_v54 = vadd.f32 %v997_v8, %v903_v14 }
 0x357   :  { %v1136_v15 = vpop.f32.mrf.mxu0 }
 0x358   :  { %909 = vmax.xlane.f32.xlu0 %v904_v54 }
 0x359   :  { %v906_v9 = vpop.f32.mrf.mxu0 }
 0x35b   :  { %v1137_v16 = vpop.f32.mrf.mxu0 }
 0x3e1   :  { %v910_v17 = vpop.xlane.xlu0 %909 }
 0x3e2   :  { %v911_v18 = vsub.f32 %v904_v54, %v910_v17 }
 0x3e4   :  { %v912_v19 = vmul.f32 1.442695, %v911_v18 }
 0x3e6   :  { %1214 = vpow2.f32 %v912_v19 }
 0x3f3   :  { %v1215_v20 = vpop.eup %1214 }
 0x3f4   :  { %914 = vadd.xlane.f32.xlu1 %v1215_v20 }
 0x47d   :  { %v915_v21 = vpop.xlane.xlu1 %914 }
 0x47e   :  { %1216 = vrcp.f32 %v915_v21 }
 0x48b   :  { %v1217_v22 = vpop.eup %1216 }
 0x48c   :  { %v917_v23 = vmul.f32 %v1217_v22, %v1215_v20 }
 0x48e   :  { %v918_v24 = vpack.c.bf16 %v917_v23, %v917_v23 }
 0x490   :  { %919 = vst [vmem:[#allocation10] sm:$0xf] %v918_v24 }
 0x491   :  { %1309 = shalt.err (!%p1306_p10)
}
 0x492   :  { %929 = dma.vmem_to_hbm [thread:$0]  %s927_s24, 64, %s1475_s7, [#allocation4]  }
 0x493   :  { %1324 = dma.done.wait [#allocation4], 64  }
 0x494   :  { %1325 = vsyncadd [#allocation4], 4294967232 }
 0x495   :  { %933 = vsyncpa [#allocation3], 1 }
 0x496   :  { %934 = vsyncpa [#allocation6], 1 }
 0x497   :  { %935 = vsyncpa [#allocation9], 1 }
 0x498   :  { %936 = vsyncpa [#allocation4], 1 }

</bundles_post_ra>
